<compile_context>
chip_gen: v7x
topology: tpu7x:2x2x1
jax: 0.10.0
libtpu: 0.0.40
codegen_flags: <defaults>
</compile_context>

<pallas_src>
import functools

import jax
import jax.numpy as jnp
from jax.experimental import pallas as pl
from jax.experimental.pallas import tpu as pltpu

voc_cfg = {"variance": [0.1, 0.2]}


def _round_up(x, m):
    return ((x + m - 1) // m) * m


@functools.lru_cache(maxsize=None)
def _vmem_limit_bytes():
    # Generation-aware scoped-VMEM budget.  Every block below is <= ~4 MiB
    # (double-buffered), so 32 MiB is ample; clamp so the request is always safe
    # (v7x: 64 MiB physical / 32 MiB scoped default; v5e/v6e: 128 MiB physical).
    try:
        cap = int(pltpu.get_tpu_info().vmem_capacity_bytes)
        return int(min(32 * 1024 * 1024, max(16 * 1024 * 1024, cap // 2)))
    except Exception:
        return 32 * 1024 * 1024


def _prior_tiling(num_priors, max_tile=8192):
    """Pad the prior axis once so it splits into equal lane tiles of <= max_tile."""
    p128 = _round_up(num_priors, 128)
    n_tiles = max(1, -(-p128 // max_tile))
    tile = _round_up(-(-p128 // n_tiles), 128)
    return tile * n_tiles, tile


# ----------------------------------------------------------------------------
# Kernel 1: fused jaccard overlap + matching reductions (per batch element)
#   truths_ref : (1, O, 4)   truncated ground-truth boxes (point form)
#   priors_ref : (4, P)      truncated priors, transposed -> P on the lane axis
# Outputs (per batch element):
#   ov_ref   (1, 1, P) f32   best IoU over objects, per prior
#   oidx_ref (1, 1, P) i32   argmax object per prior (first-max tie break)
#   pidx_ref (1, O, 1) i32   argmax prior per object (first-max tie break)
# The (O, P) IoU lives only in VMEM/vregs; nothing of size O*P goes to HBM.
# ----------------------------------------------------------------------------
def _overlap_match_kernel(a_ref, bt_ref, ov_ref, oidx_ref, pidx_ref):
    a = a_ref[0]                                    # (O, 4)
    bt = bt_ref[...]                                # (4, P)
    num_objs = a.shape[0]
    num_priors = bt.shape[1]

    ax1, ay1, ax2, ay2 = a[:, 0:1], a[:, 1:2], a[:, 2:3], a[:, 3:4]       # (O, 1)
    bx1, by1, bx2, by2 = bt[0:1, :], bt[1:2, :], bt[2:3, :], bt[3:4, :]   # (1, P)
    ix = jnp.maximum(jnp.minimum(ax2, bx2) - jnp.maximum(ax1, bx1), 0.0)  # (O, P)
    iy = jnp.maximum(jnp.minimum(ay2, by2) - jnp.maximum(ay1, by1), 0.0)
    inter = ix * iy
    area_a = (ax2 - ax1) * (ay2 - ay1)              # (O, 1)
    area_b = (bx2 - bx1) * (by2 - by1)              # (1, P)
    # Exact divide: IoU feeds threshold compares and argmaxes, so avoid the
    # approximate-reciprocal precision concern.  Degenerate boxes (union==0)
    # NaN exactly like the PyTorch reference.
    iou = inter / (area_a + area_b - inter)         # (O, P)

    # Best ground truth per prior (reduce over objects = sublane axis).
    best_ov = jnp.max(iou, axis=0, keepdims=True)                          # (1, P)
    obj_iota = jax.lax.broadcasted_iota(jnp.int32, iou.shape, 0)
    best_obj = jnp.min(jnp.where(iou == best_ov, obj_iota, jnp.int32(num_objs)),
                       axis=0, keepdims=True)                              # (1, P)
    ov_ref[0] = best_ov
    oidx_ref[0] = best_obj

    # Best prior per ground truth (reduce over priors = lane axis).
    best_pv = jnp.max(iou, axis=1, keepdims=True)                          # (O, 1)
    pri_iota = jax.lax.broadcasted_iota(jnp.int32, iou.shape, 1)
    best_pri = jnp.min(jnp.where(iou == best_pv, pri_iota, jnp.int32(num_priors)),
                       axis=1, keepdims=True)                              # (O, 1)
    pidx_ref[0] = best_pri


def overlap_match_batched(truths, priors_t):
    """truths (B, O, 4), priors_t (4, P) -> (best_ov (B,P), best_obj (B,P), best_pri (B,O))."""
    B, O, _ = truths.shape
    P = priors_t.shape[1]
    bt_ov, bt_idx, bp_idx = pl.pallas_call(
        _overlap_match_kernel,
        out_shape=(jax.ShapeDtypeStruct((B, 1, P), jnp.float32),
                   jax.ShapeDtypeStruct((B, 1, P), jnp.int32),
                   jax.ShapeDtypeStruct((B, O, 1), jnp.int32)),
        grid=(B,),
        in_specs=[pl.BlockSpec((1, O, 4), lambda b: (b, 0, 0)),
                  pl.BlockSpec((4, P), lambda b: (0, 0))],
        out_specs=(pl.BlockSpec((1, 1, P), lambda b: (b, 0, 0)),
                   pl.BlockSpec((1, 1, P), lambda b: (b, 0, 0)),
                   pl.BlockSpec((1, O, 1), lambda b: (b, 0, 0))),
        compiler_params=pltpu.CompilerParams(
            dimension_semantics=("parallel",),
            vmem_limit_bytes=_vmem_limit_bytes()),
    )(truths.astype(jnp.float32), priors_t.astype(jnp.float32))
    return bt_ov[:, 0, :], bt_idx[:, 0, :], bp_idx[:, :, 0]


# ----------------------------------------------------------------------------
# Kernel 2: per-prior conf margin  log_sum_exp(x) - x[target]
#   Lane-dense layout: classes (C ~ 8..21) on sublanes, priors on lanes.
#   x: (B, C, Pp) f32, t: (B, 1, Pp) i32  ->  (B, 1, Pp) f32
#   Grid (B, Pp // tile_p), both axes "parallel"; output is 128-lane dense.
# The per-column max shift gives exactly the reference's global-max LSE value
# (LSE is shift invariant); one pass reused for mining AND the CE sum.
# ----------------------------------------------------------------------------
def _conf_margin_kernel(x_ref, t_ref, o_ref):
    x = x_ref[0]                         # (C, T)
    t = t_ref[0]                         # (1, T) int32
    cmax = jnp.max(x, axis=0, keepdims=True)                                # (1, T)
    lse = jnp.log(jnp.sum(jnp.exp(x - cmax), axis=0, keepdims=True)) + cmax
    cls = jax.lax.broadcasted_iota(jnp.int32, x.shape, 0)                   # (C, T)
    # One-hot gather; out-of-range targets would silently contribute 0 (the
    # reference's torch.gather would raise) -- inputs here are always in [0, C).
    gathered = jnp.sum(jnp.where(cls == t, x, 0.0), axis=0, keepdims=True)  # (1, T)
    o_ref[0] = lse - gathered


def conf_margin(conf_cxp, conf_t_1xp, tile_p):
    """conf (B, C, Pp), targets (B, 1, Pp) -> margin (B, Pp)."""
    B, C, Pp = conf_cxp.shape
    out = pl.pallas_call(
        _conf_margin_kernel,
        out_shape=jax.ShapeDtypeStruct((B, 1, Pp), jnp.float32),
        grid=(B, Pp // tile_p),
        in_specs=[pl.BlockSpec((1, C, tile_p), lambda b, j: (b, 0, j)),
                  pl.BlockSpec((1, 1, tile_p), lambda b, j: (b, 0, j))],
        out_specs=pl.BlockSpec((1, 1, tile_p), lambda b, j: (b, 0, j)),
        compiler_params=pltpu.CompilerParams(
            dimension_semantics=("parallel", "parallel"),
            vmem_limit_bytes=_vmem_limit_bytes()),
    )(conf_cxp.astype(jnp.float32), conf_t_1xp.astype(jnp.int32))
    return out[:, 0, :]


# ----------------------------------------------------------------------------
# Kernel 3: masked smooth-L1 (size_average=False) partial sums
#   Lane-dense (B, 4, Pp) layout; whole prior range per block -> grid=(B,)
#   ("parallel", so v7x's 2 TensorCores split the batch).  Each step reduces
#   only over the 4 coords (sublane axis) and writes a lane-dense (1, Pp)
#   partial row; the tiny (B, Pp) final sum is done in XLA.  No SMEM scalar
#   accumulator, no per-step cross-lane reduction, no serialization.
# ----------------------------------------------------------------------------
def _smooth_l1_kernel(lp_ref, lt_ref, ct_ref, o_ref):
    d = lp_ref[0] - lt_ref[0]                          # (4, Pp)
    ad = jnp.abs(d)
    loss = jnp.where(ad < 1.0, 0.5 * d * d, ad - 0.5)
    mask = (ct_ref[0] > 0).astype(jnp.float32)         # (1, Pp)
    o_ref[0] = jnp.sum(loss * mask, axis=0, keepdims=True)   # (1, Pp)


def smooth_l1_masked_sum(lp, lt, ct):
    """sum_{pos priors} smooth_l1(loc_p - loc_t); inputs already (B, 4|1, Pp) padded."""
    B, _, Pp = lp.shape
    # TODO(synk): for extremely large prior counts (P >> 100k) add a lane-tile
    # grid axis here; at SSD scale a full-P block is ~0.3 MiB and optimal.
    partial = pl.pallas_call(
        _smooth_l1_kernel,
        out_shape=jax.ShapeDtypeStruct((B, 1, Pp), jnp.float32),
        grid=(B,),
        in_specs=[pl.BlockSpec((1, 4, Pp), lambda b: (b, 0, 0)),
                  pl.BlockSpec((1, 4, Pp), lambda b: (b, 0, 0)),
                  pl.BlockSpec((1, 1, Pp), lambda b: (b, 0, 0))],
        out_specs=pl.BlockSpec((1, 1, Pp), lambda b: (b, 0, 0)),
        compiler_params=pltpu.CompilerParams(
            dimension_semantics=("parallel",),
            vmem_limit_bytes=_vmem_limit_bytes()),
    )(lp, lt, ct)
    return jnp.sum(partial)


# ----------------------------------------------------------------------------
# JAX glue: encode / per-sample match (data-dependent scatter/gather), vmapped.
# ----------------------------------------------------------------------------
def encode(matched, priors, variances):
    g_cxcy = (matched[:, :2] + matched[:, 2:]) / 2.0 - priors[:, :2]
    g_cxcy = g_cxcy / (variances[0] * priors[:, 2:])
    g_wh = (matched[:, 2:] - matched[:, :2]) / priors[:, 2:]
    g_wh = jnp.log(g_wh) / variances[1]
    return jnp.concatenate([g_cxcy, g_wh], axis=1)


def _match_single(threshold, variances, priors, truths, labels, bt_ov, bt_idx, bp_idx):
    """Per-sample matching (vmapped).  bt_ov/bt_idx: (P,), bp_idx: (O,)."""
    num_objs = truths.shape[0]
    # best_true_overlap.index_fill_(0, best_prior_idx, 2)
    bt_ov = bt_ov.at[bp_idx].set(2.0)
    # Sequential "best_true_idx[best_prior_idx[j]] = j" loop: last write (largest j)
    # wins -> deterministic scatter-max of j over a -1-initialized buffer.
    j_for = jnp.full(bt_idx.shape, -1, jnp.int32).at[bp_idx].max(
        jnp.arange(num_objs, dtype=jnp.int32))
    bt_idx = jnp.where(j_for >= 0, j_for, bt_idx)
    matches = truths[bt_idx]                           # (P, 4)
    conf = labels[bt_idx] + 1.0
    conf = jnp.where(bt_ov < threshold, 0.0, conf)
    loc = encode(matches, priors, variances)
    return loc, conf.astype(jnp.int32)


# ----------------------------------------------------------------------------
# MutiBoxLoss
# ----------------------------------------------------------------------------
class MutiBoxLoss:
    def __init__(self, num_classes, overlap_thresh, prior_for_matching, bkg_label,
                 neg_mining, neg_pos, neg_overlap, encode_target, use_gpu=True):
        self.use_gpu = use_gpu
        self.num_classes = num_classes
        self.threshold = overlap_thresh
        self.background_label = bkg_label
        self.encode_trget = encode_target
        self.use_prior_for_matching = prior_for_matching
        self.do_neg_mining = neg_mining
        self.negpos_ratio = neg_pos
        self.neg_overlap = neg_overlap
        self.variance = voc_cfg["variance"]

    def forward(self, predictions, targets):
        loc_data, conf_data, priors = predictions
        num = loc_data.shape[0]
        priors = priors[: loc_data.shape[1], :]
        num_priors = priors.shape[0]
        num_classes = self.num_classes

        truths = targets[:, :, :-1]                  # (B, O, 4)
        labels = targets[:, :, -1]                   # (B, O)

        # ---- matching: fused IoU + reductions in ONE Pallas pass ------------
        # Faithful to the reference: overlap(truths.long(), priors.long())
        # truncates coordinates toward zero before the IoU.
        t_trunc = truths.astype(jnp.int32).astype(jnp.float32)
        p_trunc_t = priors.astype(jnp.int32).astype(jnp.float32).T      # (4, P)
        bt_ov, bt_idx, bp_idx = overlap_match_batched(t_trunc, p_trunc_t)

        match_fn = functools.partial(_match_single, self.threshold, self.variance, priors)
        loc_t, conf_t = jax.vmap(match_fn)(truths, labels, bt_ov, bt_idx, bp_idx)
        pos = conf_t > 0                                                # (B, P)

        # ---- pad the prior axis once: clean 128-lane tiles for kernels 2 & 3 -
        p_pad, tile_p = _prior_tiling(num_priors)
        pad = p_pad - num_priors
        lp = jnp.transpose(loc_data.astype(jnp.float32), (0, 2, 1))     # (B, 4, P)
        lt = jnp.transpose(loc_t.astype(jnp.float32), (0, 2, 1))
        ct = conf_t.astype(jnp.int32).reshape(num, 1, num_priors)       # (B, 1, P)
        xc = jnp.transpose(conf_data.astype(jnp.float32), (0, 2, 1))    # (B, C, P)
        if pad:
            pw = ((0, 0), (0, 0), (0, pad))
            lp = jnp.pad(lp, pw)
            lt = jnp.pad(lt, pw)
            ct = jnp.pad(ct, pw)            # padded conf_t = 0 -> mask = 0
            xc = jnp.pad(xc, pw)

        # ---- localization loss (Pallas, lane-dense, per-batch partials) -----
        loss_l = smooth_l1_masked_sum(lp, lt, ct)

        # ---- confidence margin: ONE lane-dense pass over conf_data ----------
        margin = conf_margin(xc, ct, tile_p)[:, :num_priors]            # (B, P)

        # ---- hard negative mining (XLA glue) --------------------------------
        loss_c_rank = jnp.where(pos, 0.0, margin)             # zero out positives
        loss_idx = jnp.argsort(-loss_c_rank, axis=1)          # descending (stable)
        # idx_rank = inverse permutation via scatter (replaces the second argsort).
        ranks = jnp.broadcast_to(jnp.arange(num_priors, dtype=jnp.int32),
                                 (num, num_priors))
        idx_rank = jnp.zeros((num, num_priors), jnp.int32).at[
            jnp.arange(num)[:, None], loss_idx].set(ranks)
        num_pos = jnp.sum(pos.astype(jnp.int32), axis=1, keepdims=True)
        num_neg = jnp.minimum(self.negpos_ratio * num_pos, num_priors - 1)
        neg = idx_rank < num_neg                              # (B, P)
        # TODO(synk): a per-row dynamic-k top_k with exact-rank tie handling would
        # remove the remaining full sort; kept rank-exact (stable argsort) here.

        # Cross-entropy for the selected rows equals the margin already computed
        # (LSE is max-shift invariant) -> no second pass over conf_data.
        sel = jnp.logical_or(pos, neg)                        # (pos_idx + neg_idx).gt(0)
        loss_c_sum = jnp.sum(margin * sel.astype(jnp.float32))

        # NOTE: like the PyTorch reference, a batch with zero positives divides by 0.
        N = jnp.sum(num_pos).astype(jnp.float32)
        return loss_l / N, loss_c_sum / N

    __call__ = forward


if __name__ == "__main__":
    key = jax.random.PRNGKey(0)
    k1, k2, k3, k4, k5, k6, k7 = jax.random.split(key, 7)

    batch, num_priors, num_classes, num_objs = 2, 128, 8, 4

    # predictions
    loc_data = 0.1 * jax.random.normal(k1, (batch, num_priors, 4), dtype=jnp.float32)
    conf_data = jax.random.normal(k2, (batch, num_priors, num_classes), dtype=jnp.float32)

    # priors in point-form-like pixel coordinates (x1, y1, x2, y2), x2>x1, y2>y1
    p_min = jax.random.uniform(k3, (num_priors, 2), minval=20.0, maxval=150.0)
    p_wh = jax.random.uniform(k4, (num_priors, 2), minval=25.0, maxval=130.0)
    priors = jnp.concatenate([p_min, p_min + p_wh], axis=1).astype(jnp.float32)

    # ground truth boxes (pixel coords) + integer labels in last column
    t_min = jax.random.uniform(k5, (batch, num_objs, 2), minval=10.0, maxval=150.0)
    t_wh = jax.random.uniform(k6, (batch, num_objs, 2), minval=20.0, maxval=120.0)
    labels = jax.random.randint(k7, (batch, num_objs, 1), 0, num_classes - 1).astype(jnp.float32)
    targets = jnp.concatenate([t_min, t_min + t_wh, labels], axis=2).astype(jnp.float32)

    criterion = MutiBoxLoss(num_classes=num_classes, overlap_thresh=0.5,
                            prior_for_matching=True, bkg_label=0, neg_mining=True,
                            neg_pos=3, neg_overlap=0.5, encode_target=False,
                            use_gpu=False)

    loss_l, loss_c = criterion((loc_data, conf_data, priors), targets)
    jax.block_until_ready((loss_l, loss_c))
    print("KERNEL_OK")
</pallas_src>

<mosaic_0001>
module attributes {stable_mosaic.version = 11 : i64} {
  func.func @_overlap_match_kernel(%arg0: i32, %arg1: memref<1x4x4xf32, #tpu.memory_space<vmem>>, %arg2: memref<4x128xf32, #tpu.memory_space<vmem>>, %arg3: memref<1x1x128xf32, #tpu.memory_space<vmem>>, %arg4: memref<1x1x128xi32, #tpu.memory_space<vmem>>, %arg5: memref<1x4x1xi32, #tpu.memory_space<vmem>>) attributes {dimension_semantics = [#tpu.dimension_semantics<parallel>], iteration_bounds = array<i64: 2>, scalar_prefetch = 0 : i64, scratch_operands = 0 : i64, tpu.core_type = #tpu.core_type<tc>, window_params = [{transform_indices = @transform_0, window_bounds = array<i64: 1, 4, 4>}, {pipeline_mode = #tpu.pipeline_mode<synchronous>, transform_indices = @transform_1, window_bounds = array<i64: 4, 128>}, {transform_indices = @transform_2, window_bounds = array<i64: 1, 1, 128>}, {transform_indices = @transform_3, window_bounds = array<i64: 1, 1, 128>}, {transform_indices = @transform_4, window_bounds = array<i64: 1, 4, 1>}]} {
    %c0 = arith.constant 0 : index
    %c0_0 = arith.constant 0 : index
    %c0_1 = arith.constant 0 : index
    %0 = vector.load %arg1[%c0, %c0_0, %c0_1] : memref<1x4x4xf32, #tpu.memory_space<vmem>>, vector<1x4x4xf32>
    %1 = vector.shape_cast %0 : vector<1x4x4xf32> to vector<4x4xf32>
    %c0_2 = arith.constant 0 : index
    %c0_3 = arith.constant 0 : index
    %2 = vector.load %arg2[%c0_2, %c0_3] : memref<4x128xf32, #tpu.memory_space<vmem>>, vector<4x128xf32>
    %3 = vector.extract_strided_slice %1 {offsets = [0, 0], sizes = [4, 1], strides = [1, 1]} : vector<4x4xf32> to vector<4x1xf32>
    %4 = vector.extract_strided_slice %1 {offsets = [0, 1], sizes = [4, 1], strides = [1, 1]} : vector<4x4xf32> to vector<4x1xf32>
    %5 = vector.extract_strided_slice %1 {offsets = [0, 2], sizes = [4, 1], strides = [1, 1]} : vector<4x4xf32> to vector<4x1xf32>
    %6 = vector.extract_strided_slice %1 {offsets = [0, 3], sizes = [4, 1], strides = [1, 1]} : vector<4x4xf32> to vector<4x1xf32>
    %7 = vector.extract_strided_slice %2 {offsets = [0, 0], sizes = [1, 128], strides = [1, 1]} : vector<4x128xf32> to vector<1x128xf32>
    %8 = vector.extract_strided_slice %2 {offsets = [1, 0], sizes = [1, 128], strides = [1, 1]} : vector<4x128xf32> to vector<1x128xf32>
    %9 = vector.extract_strided_slice %2 {offsets = [2, 0], sizes = [1, 128], strides = [1, 1]} : vector<4x128xf32> to vector<1x128xf32>
    %10 = vector.extract_strided_slice %2 {offsets = [3, 0], sizes = [1, 128], strides = [1, 1]} : vector<4x128xf32> to vector<1x128xf32>
    %11 = vector.broadcast %5 : vector<4x1xf32> to vector<4x128xf32>
    %12 = vector.broadcast %9 : vector<1x128xf32> to vector<4x128xf32>
    %13 = arith.minimumf %11, %12 : vector<4x128xf32>
    %14 = vector.broadcast %3 : vector<4x1xf32> to vector<4x128xf32>
    %15 = vector.broadcast %7 : vector<1x128xf32> to vector<4x128xf32>
    %16 = arith.maximumf %14, %15 : vector<4x128xf32>
    %17 = arith.subf %13, %16 : vector<4x128xf32>
    %cst = arith.constant 0.000000e+00 : f32
    %18 = vector.broadcast %cst : f32 to vector<4x128xf32>
    %19 = arith.maximumf %17, %18 : vector<4x128xf32>
    %20 = vector.broadcast %6 : vector<4x1xf32> to vector<4x128xf32>
    %21 = vector.broadcast %10 : vector<1x128xf32> to vector<4x128xf32>
    %22 = arith.minimumf %20, %21 : vector<4x128xf32>
    %23 = vector.broadcast %4 : vector<4x1xf32> to vector<4x128xf32>
    %24 = vector.broadcast %8 : vector<1x128xf32> to vector<4x128xf32>
    %25 = arith.maximumf %23, %24 : vector<4x128xf32>
    %26 = arith.subf %22, %25 : vector<4x128xf32>
    %cst_4 = arith.constant 0.000000e+00 : f32
    %27 = vector.broadcast %cst_4 : f32 to vector<4x128xf32>
    %28 = arith.maximumf %26, %27 : vector<4x128xf32>
    %29 = arith.mulf %19, %28 : vector<4x128xf32>
    %30 = arith.subf %5, %3 : vector<4x1xf32>
    %31 = arith.subf %6, %4 : vector<4x1xf32>
    %32 = arith.mulf %30, %31 : vector<4x1xf32>
    %33 = arith.subf %9, %7 : vector<1x128xf32>
    %34 = arith.subf %10, %8 : vector<1x128xf32>
    %35 = arith.mulf %33, %34 : vector<1x128xf32>
    %36 = vector.broadcast %32 : vector<4x1xf32> to vector<4x128xf32>
    %37 = vector.broadcast %35 : vector<1x128xf32> to vector<4x128xf32>
    %38 = arith.addf %36, %37 : vector<4x128xf32>
    %39 = arith.subf %38, %29 : vector<4x128xf32>
    %40 = arith.divf %29, %39 : vector<4x128xf32>
    %cst_5 = arith.constant dense<0xFF800000> : vector<128xf32>
    %41 = vector.multi_reduction <maximumf>, %40, %cst_5 [0] : vector<4x128xf32> to vector<128xf32>
    %42 = vector.shape_cast %41 : vector<128xf32> to vector<1x128xf32>
    %43 = tpu.iota {dimensions = array<i32: 0>} : vector<4x128xi32>
    %44 = vector.broadcast %42 : vector<1x128xf32> to vector<4x128xf32>
    %45 = arith.cmpf oeq, %40, %44 : vector<4x128xf32>
    %c4_i32 = arith.constant 4 : i32
    %46 = vector.broadcast %c4_i32 : i32 to vector<4x128xi32>
    %47 = arith.select %45, %43, %46 : vector<4x128xi1>, vector<4x128xi32>
    %cst_6 = arith.constant dense<2147483647> : vector<128xi32>
    %48 = vector.multi_reduction <minsi>, %47, %cst_6 [0] : vector<4x128xi32> to vector<128xi32>
    %49 = vector.shape_cast %48 : vector<128xi32> to vector<1x128xi32>
    %c0_7 = arith.constant 0 : index
    %c0_8 = arith.constant 0 : index
    %c0_9 = arith.constant 0 : index
    %50 = vector.load %arg3[%c0_7, %c0_8, %c0_9] : memref<1x1x128xf32, #tpu.memory_space<vmem>>, vector<1x1x128xf32>
    %51 = vector.shape_cast %50 : vector<1x1x128xf32> to vector<1x128xf32>
    %52 = vector.shape_cast %42 : vector<1x128xf32> to vector<1x1x128xf32>
    tpu.vector_store %arg3[%c0_7, %c0_8, %c0_9], %52 {strides = array<i32>} : memref<1x1x128xf32, #tpu.memory_space<vmem>>, vector<1x1x128xf32>,
    %c0_10 = arith.constant 0 : index
    %c0_11 = arith.constant 0 : index
    %c0_12 = arith.constant 0 : index
    %53 = vector.load %arg4[%c0_10, %c0_11, %c0_12] : memref<1x1x128xi32, #tpu.memory_space<vmem>>, vector<1x1x128xi32>
    %54 = vector.shape_cast %53 : vector<1x1x128xi32> to vector<1x128xi32>
    %55 = vector.shape_cast %49 : vector<1x128xi32> to vector<1x1x128xi32>
    tpu.vector_store %arg4[%c0_10, %c0_11, %c0_12], %55 {strides = array<i32>} : memref<1x1x128xi32, #tpu.memory_space<vmem>>, vector<1x1x128xi32>,
    %cst_13 = arith.constant dense<0xFF800000> : vector<4xf32>
    %56 = vector.multi_reduction <maximumf>, %40, %cst_13 [1] : vector<4x128xf32> to vector<4xf32>
    %57 = vector.shape_cast %56 : vector<4xf32> to vector<4x1xf32>
    %58 = tpu.iota {dimensions = array<i32: 1>} : vector<4x128xi32>
    %59 = vector.broadcast %57 : vector<4x1xf32> to vector<4x128xf32>
    %60 = arith.cmpf oeq, %40, %59 : vector<4x128xf32>
    %c128_i32 = arith.constant 128 : i32
    %61 = vector.broadcast %c128_i32 : i32 to vector<4x128xi32>
    %62 = arith.select %60, %58, %61 : vector<4x128xi1>, vector<4x128xi32>
    %cst_14 = arith.constant dense<2147483647> : vector<4xi32>
    %63 = vector.multi_reduction <minsi>, %62, %cst_14 [1] : vector<4x128xi32> to vector<4xi32>
    %64 = vector.shape_cast %63 : vector<4xi32> to vector<4x1xi32>
    %c0_15 = arith.constant 0 : index
    %c0_16 = arith.constant 0 : index
    %c0_17 = arith.constant 0 : index
    %65 = vector.load %arg5[%c0_15, %c0_16, %c0_17] : memref<1x4x1xi32, #tpu.memory_space<vmem>>, vector<1x4x1xi32>
    %66 = vector.shape_cast %65 : vector<1x4x1xi32> to vector<4x1xi32>
    %67 = vector.shape_cast %64 : vector<4x1xi32> to vector<1x4x1xi32>
    tpu.vector_store %arg5[%c0_15, %c0_16, %c0_17], %67 {strides = array<i32>} : memref<1x4x1xi32, #tpu.memory_space<vmem>>, vector<1x4x1xi32>,
    return
  }
  func.func @transform_0(%arg0: i32) -> (i32, i32, i32) {
    %c0_i32 = arith.constant 0 : i32
    %c0_i32_0 = arith.constant 0 : i32
    %c0_i32_1 = arith.constant 0 : i32
    return %arg0, %c0_i32, %c0_i32_0 : i32, i32, i32
  }
  func.func @transform_1(%arg0: i32) -> (i32, i32) {
    %c0_i32 = arith.constant 0 : i32
    %c0_i32_0 = arith.constant 0 : i32
    %c0_i32_1 = arith.constant 0 : i32
    return %c0_i32, %c0_i32_0 : i32, i32
  }
  func.func @transform_2(%arg0: i32) -> (i32, i32, i32) {
    %c0_i32 = arith.constant 0 : i32
    %c0_i32_0 = arith.constant 0 : i32
    %c0_i32_1 = arith.constant 0 : i32
    return %arg0, %c0_i32, %c0_i32_0 : i32, i32, i32
  }
  func.func @transform_3(%arg0: i32) -> (i32, i32, i32) {
    %c0_i32 = arith.constant 0 : i32
    %c0_i32_0 = arith.constant 0 : i32
    %c0_i32_1 = arith.constant 0 : i32
    return %arg0, %c0_i32, %c0_i32_0 : i32, i32, i32
  }
  func.func @transform_4(%arg0: i32) -> (i32, i32, i32) {
    %c0_i32 = arith.constant 0 : i32
    %c0_i32_0 = arith.constant 0 : i32
    %c0_i32_1 = arith.constant 0 : i32
    return %arg0, %c0_i32, %c0_i32_0 : i32, i32, i32
  }
}

</mosaic_0001>

<bundles_post_ra>
// kernel: tpu_custom_call.1
= control target key start
LH: loop header
LB: loop body
LE: loop exit
PB: predicated region body
PF: predicated region fallthrough
CT: control target
= control target key end

     0   :  { %10 = vsyncpa [#allocation3], 0  ;;  %s1062_s0 = inlined_call_operand.hbm [shape: f32[2,4,4], index: 0, kind: input, shape index: {}]   ;;  %s1063_s1 = inlined_call_operand.hbm [shape: f32[4,128], index: 1, kind: input, shape index: {}]   ;;  %s1064_s2 = inlined_call_operand.hbm [shape: f32[2,1,128], index: 2, kind: output, shape index: {0}]   ;;  %s1065_s3 = inlined_call_operand.hbm [shape: s32[2,1,128], index: 3, kind: output, shape index: {1}]   ;;  %s1066_s4 = inlined_call_operand.vmem [shape: s32[2,4,1], index: 4, kind: output, shape index: {2}]  }
   0x1   :  { %12 = vsyncpa [#allocation3 + $0x1], 0 }
   0x2   :  { %13 = vsyncpa [#allocation6], 0 }
   0x3   :  { %14 = vsyncpa [#allocation4], 0 }
   0x4   :  { %16 = vsyncpa [#allocation4 + $0x1], 0 }
   0x5   :  { %17 = vsyncpa [#allocation9], 0 }
   0x6   :  { %19 = vsyncpa [#allocation9 + $0x1], 0  ;;  %s818_s15 = smov 0   ;;  %s820_s16 = smov 0  }
   0x7   :  { %s822_s17 = smov 0   ;;  %s824_s18 = smov 0  }
   0x8 LB: > { %s839_s19 = sadd.s32 4294967295, %s781_s18   ;;  %s531_s20 = sadd.s32 4294967294, %s781_s18   ;;  %s781_s18 = sphi %s824_s18, %s1090_s18   ;;  %s777_s17 = sphi %s822_s17, %s1089_s17   ;;  %s773_s16 = sphi %s820_s16, %s1088_s16   ;;  %s769_s15 = sphi %s818_s15, %s1087_s15  }
   0x9   : > { %p45_p0 = scmp.ne.s32.totalorder %s773_s16, %s769_s15  ;;  %p1067_p1 = scmp.eq.s32.totalorder %s839_s19, 0 }
   0xa   : > { %p96_p3 = scmp.eq.s32.totalorder %s531_s20, 1  ;;  %p532_p5 = scmp.ge.s32.totalorder %s781_s18, 1 }
   0xb   : > { %p848_p4 = por %p1067_p1, %p45_p0  ;;  %p155_p7 = scmp.lt.s32.totalorder %s781_s18, 3 }
   0xc   : > { %p853_p6 = por %p96_p3, %p45_p0  ;;  %s783_s24 = smov [#allocation5]  }
   0xd   : > { %s1070_s21 = scalar_select %p848_p4, 1, 0 }
   0xe   : > { %s1071_s22 = scalar_select %p853_p6, 1, 0 }
   0xf   : > { %p858_p8 = pnand %p532_p5, %p155_p7  ;;  %s168_s25 = sshll.u32 %s783_s24, 4  ;;  %s169_s25 = int_to_ptr.vmem [resolvable:$true] %s168_s25 }
  0x10   : > { %s866_s26 = sadd.s32 1, %s781_s18   ;;  %s32_s30 = sadd.s32 1, %s777_s17 }
  0x11   : > { %s1072_s23 = scalar_select %p858_p8, 1, 0 }
  0x12   : > { %p555_p10 = pneg %p858_p8  ;;  %s29_s28 = ssub.s32 %s781_s18, %s866_s26 }
  0x13   : > { %p876_p12 = scmp.eq.s32.totalorder %s29_s28, 0  ;;  %s621_s7 = scalar_lea.hbm %s1063_s1, 64 }
  0x14   : > { %p870_p11 = pnand %p555_p10, %p1067_p1  ;;  %p622_p0 = scmp.ne.s32.totalorder %s1063_s1, %s621_s7 }
  0x15   : > { %s1074_s29 = scalar_select %p876_p12, 1, 0 }
  0x16   : > { %p623_p3 = pneg %p870_p11  ;;  %p628_p10 = scmp.lt.u32.totalorder %s621_s7, %s1063_s1 }
  0x18   : > { %p624_p5 = pnand %p623_p3, %p622_p0 }
  0x1a   : > { %p625_p7 = pneg %p624_p5 }
  0x1c   : > { %p630_p9 = pnand %p628_p10, %p625_p7 }
  0x1e   : > { %633 = shalt.err (!%p630_p9)
}
  0x1f   : > { %s634_s12 = scalar_lea.vmem %s169_s25, 64  ;;  %p642_p6 = scmp.lt.s32.totalorder %s169_s25, %s169_s25 }
  0x20   : > { %p635_p1 = scmp.ne.s32.totalorder %s169_s25, %s634_s12  ;;  %p643_p4 = scmp.lt.s32.totalorder %s634_s12, %s634_s12 }
  0x22   : > { %p637_p2 = pnand %p635_p1, %p623_p3  ;;  %p644_p8 = por %p643_p4, %p642_p6 }
  0x24   : > { %p638_p13 = pneg %p637_p2 }
  0x26   : > { %p645_p12 = pnand %p644_p8, %p638_p13 }
  0x28   : > { %648 = shalt.err (!%p645_p12)
}
  0x29   : > { %558 = dma.hbm_to_vmem [thread:$0]  (!%p870_p11), %s1063_s1, 64, %s169_s25, [#allocation6]  }
  0x2a   : > { %p1075_p1 = scmp.ne.s32.totalorder %s1074_s29, 0  ;;  %p40_p2 = scmp.eq.s32.totalorder %s781_s18, 0 }
  0x2b   : > { %p1076_p4 = scmp.ne.s32.totalorder %s777_s17, %s773_s16  ;;  %p1077_p6 = scmp.eq.s32.totalorder %s839_s19, 1 }
  0x2c   : > { %s902_s20 = scalar_select %p1075_p1, %s777_s17, %s32_s30  }
  0x2d   : > { %p910_p8 = por %p1077_p6, %p1076_p4  ;;  %p571_p9 = scmp.lt.s32.totalorder %s781_s18, 2 }
  0x2e   : > { %s179_s27 = sand.u32 1, %s777_s17   ;;  %p1079_p12 = pmov %p1076_p4 }
  0x2f   : > { %s535_s28 = sshll.u32 %s179_s27, 2  ;;  %s536_s5 = sshll.u32 %s781_s18, 6 }
  0x30   : > { %p41_p13 = por %p40_p2, %p1079_p12  ;;  %s923_s25 = scalar_lea.hbm %s1062_s0, %s536_s5 }
  0x31   : > { %s183_s29 = scalar_lea.vmem [#allocation2], %s535_s28  ;;  %s180_s9 = scalar_lea.sflag [#allocation3], %s179_s27 }
  0x32   : > { %s190_s30 = sshll.u32 %s183_s29, 4  ;;  %p925_p11 = pnand %p571_p9, %p41_p13  ;;  %s929_s30 = int_to_ptr.vmem [resolvable:$true] %s190_s30 }
  0x33   : > { %s649_s10 = scalar_lea.hbm %s923_s25, 64  ;;  %s654_s13 = scalar_lea.hbm %s1062_s0, 128 }
  0x34   : > { %p650_p0 = scmp.ne.s32.totalorder %s923_s25, %s649_s10  ;;  %p651_p3 = pneg %p925_p11 }
  0x35   : > { %p655_p10 = scmp.lt.u32.totalorder %s923_s25, %s1062_s0  ;;  %p656_p1 = scmp.lt.u32.totalorder %s654_s13, %s649_s10 }
  0x36   : > { %p652_p5 = pnand %p651_p3, %p650_p0  ;;  %p658_p4 = scmp.lt.u32.totalorder %s649_s10, %s923_s25 }
  0x37   : > { %p657_p2 = por %p656_p1, %p655_p10 }
  0x38   : > { %p653_p7 = pneg %p652_p5 }
  0x39   : > { %p659_p6 = por %p658_p4, %p657_p2 }
  0x3b   : > { %p660_p9 = pnand %p659_p6, %p653_p7 }
  0x3d   : > { %663 = shalt.err (!%p660_p9)
}
  0x3e   : > { %s664_s27 = scalar_lea.vmem %s929_s30, 64  ;;  %s784_s5 = smov [#allocation2]  }
  0x3f   : > { %p665_p12 = scmp.ne.s32.totalorder %s929_s30, %s664_s27  ;;  %s669_s6 = sshll.u32 %s784_s5, 4  ;;  %s670_s6 = int_to_ptr.vmem [resolvable:$false] %s669_s6 }
  0x40   : > { %s671_s7 = scalar_lea.vmem %s670_s6, 128  ;;  %p672_p5 = scmp.lt.s32.totalorder %s929_s30, %s670_s6 }
  0x41   : > { %p667_p13 = pnand %p665_p12, %p651_p3  ;;  %p673_p10 = scmp.lt.s32.totalorder %s671_s7, %s664_s27 }
  0x43   : > { %p668_p0 = pneg %p667_p13  ;;  %p674_p1 = por %p673_p10, %p672_p5 }
  0x45   : > { %p675_p2 = pnand %p674_p1, %p668_p0 }
  0x47   : > { %678 = shalt.err (!%p675_p2)
}
  0x48   : > { %562 = dma.hbm_to_vmem [thread:$0]  (!%p925_p11), %s923_s25, 64, %s929_s30, %s180_s9  }
  0x49   : > { %p1081_p7 = scmp.ne.s32.totalorder %s1072_s23, 0 }
  0x4a   : > { %s959_s29 = sand.u32 (!%p1081_p7), 1, %s773_s16   ;;  %p1082_p3 = scmp.ne.s32.totalorder (!%p1081_p7), %s1070_s21, 0 }
  0x4b   : > { %199 = sbr.rel (%p1081_p7) target bundleno = 908 (0x38c), region = 28  ;;  %s538_s10 = sshll.u32 (!%p1081_p7), %s959_s29, 2 }
  0x4c   : > { %s202_s11 = scalar_lea.sflag (!%p1081_p7), [#allocation3], %s959_s29  ;;  %s205_s12 = scalar_lea.vmem (!%p1081_p7), [#allocation2], %s538_s10 }
  0x52   : > { %752 = dma.done.wait (%p1082_p3), %s202_s11, 64  }
  0x53   : > { %754 = vsyncadd (%p1082_p3), %s202_s11, 4294967232  ;;  %p1083_p4 = scmp.eq.s32.totalorder %s839_s19, 0 }
  0x55   : > { %756 = dma.done.wait (%p1083_p4), [#allocation6], 64   ;;  %p1084_p11 = pmov %p1083_p4 }
  0x56   : > { %v785_v0 = vmov 2   ;;  %v786_v1 = vmov 3   ;;  %v245_v2 = vld [vmem:[%s205_s12] sm:$0xf]  ;;  %s787_s23 = smov 2   ;;  %v788_v3 = vmov 0   ;;  %v252_v9 = vlaneseq }
  0x57   : > { %758 = vsyncadd (%p1084_p11), [#allocation6], 4294967232  ;;  %613 = vset.pattern.permute.xlu1 %v785_v0  ;;  %615 = vset.pattern.permute.xlu0 %v786_v1  ;;  %v789_v4 = vmov 1   ;;  %s790_s21 = smov 127   ;;  %v246_v12 = vld [vmem:[#allocation5] sm:$0xf] }
  0x58   : > { %289 = vrot.lane.b32.xlu0 %v245_v2, %s787_s23  ;;  %249 = vperm.xlu1 %613, %v245_v2   ;;  %v253_v11 = vshrl.u32 %v252_v9, 7  ;;  %v299_v18 = vrot.slane %v246_v12, 6  ;;  %vm319_vm0 = vcmask 1043456   ;;  %s228_s25 = scalar_lea.vmem [#allocation7], %s959_s29  ;;  %s234_s30 = scalar_lea.vmem [#allocation8], %s959_s29  ;;  %v346_v58 = vand.u32 127, %v252_v9 }
  0x59   : > { %s541_s8 = sshll.u32 %s839_s19, 4  ;;  %s387_s9 = sshll.u32 %s228_s25, 4  ;;  %s388_s9 = int_to_ptr.vmem [resolvable:$true] %s387_s9 }
  0x5a   : > { %v254_v13 = vsub.s32 2, %v253_v11  ;;  %v263_v15 = vsub.s32 0, %v253_v11  ;;  %v283_v16 = vsub.s32 1, %v253_v11  ;;  %v274_v17 = vsub.s32 3, %v253_v11  ;;  %s991_s28 = scalar_lea.hbm %s1064_s2, %s541_s8  ;;  %s367_s27 = scalar_lea.sflag [#allocation4], %s959_s29 }
  0x5b   : > { %v301_v23 = vsub.f32 %v246_v12, %v299_v18  ;;  %s679_s5 = scalar_lea.vmem %s388_s9, 16  ;;  %s791_s6 = smov [#allocation7]  }
  0x5c   : > { %614 = vset.pattern.permute.xlu1 %v788_v3  ;;  %v255_v19 = vrot.slane %v246_v12, %v254_v13  ;;  %v264_v20 = vrot.slane %v246_v12, %v263_v15  ;;  %v284_v21 = vrot.slane %v246_v12, %v283_v16  ;;  %v275_v22 = vrot.slane %v246_v12, %v274_v17  ;;  %p680_p6 = scmp.ne.s32.totalorder %s388_s9, %s679_s5  ;;  %s683_s7 = sshll.u32 %s791_s6, 4  ;;  %s684_s7 = int_to_ptr.vmem [resolvable:$false] %s683_s7 }
  0x5d   : > { %258 = vperm.xlu1 %614, %v245_v2   ;;  %v303_v30 = vrot.slane %v301_v23, 1  ;;  %s685_s10 = scalar_lea.vmem %s684_s7, 32  ;;  %p686_p13 = scmp.lt.s32.totalorder %s388_s9, %s684_s7 }
  0x5e   : > { %p681_p9 = pnand %p680_p6, %p910_p8  ;;  %p687_p0 = scmp.lt.s32.totalorder %s685_s10, %s679_s5 }
  0x5f   : > { %v305_v33 = vmul.f32 %v303_v30, %v301_v23 }
  0x60   : > { %p682_p12 = pneg %p681_p9  ;;  %p688_p5 = por %p687_p0, %p686_p13 }
  0x61   : > { %616 = vset.pattern.permute.xlu1 %v789_v4  ;;  %v314_v36 = vrot.slane %v305_v33, %v254_v13 }
  0x62   : > { %278 = vperm.xlu1 %616, %v245_v2   ;;  %p689_p10 = pnand %p688_p5, %p682_p12 }
  0x66   : > { %617 = vset.pattern.permute.xlu1 %v785_v0 }
  0xca   : > { %v290_v5 = vpop.permute.xlu0 %289 }
  0xcb   : > { %v292_v6 = vsub.f32 %v245_v2, %v290_v5 }
  0xcd   : > { %294 = vrot.lane.b32.xlu0 %v292_v6, %s790_s21 }
  0xd1   : > { %269 = vperm.xlu0 %615, %v245_v2  }
  0xd5   : > { %618 = vset.pattern.permute.xlu0 %v785_v0 }
  0xd7   : > { %v250_v10 = vpop.permute.xlu1 %249 }
  0xd8   : > { %v256_v26 = vmin.f32 %v250_v10, %v255_v19 }
  0xdc   : > { %v259_v14 = vpop.permute.xlu1 %258 }
  0xdd   : > { %v265_v27 = vmax.f32 %v259_v14, %v264_v20 }
  0xdf   : > { %v266_v31 = vsub.f32 %v256_v26, %v265_v27 }
  0xe1   : > { %v279_v24 = vpop.permute.xlu1 %278  ;;  %v267_v34 = vmax.f32 %v266_v31, 0.0 }
  0xe2   : > { %v285_v28 = vmax.f32 %v279_v24, %v284_v21 }
 0x13f   : > { %v295_v7 = vpop.permute.xlu0 %294 }
 0x140   : > { %v297_v8 = vmul.f32 %v295_v7, %v292_v6 }
 0x142   : > { %308 = vperm.xlu1 %617, %v297_v8  }
 0x150   : > { %v270_v25 = vpop.permute.xlu0 %269 }
 0x151   : > { %v276_v29 = vmin.f32 %v270_v25, %v275_v22 }
 0x153   : > { %v286_v32 = vsub.f32 %v276_v29, %v285_v28 }
 0x155   : > { %v287_v35 = vmax.f32 %v286_v32, 0.0 }
 0x157   : > { %v288_v38 = vmul.f32 %v287_v35, %v267_v34 }
 0x1c1   : > { %v309_v37 = vpop.permute.xlu1 %308 }
 0x1c2   : > { %v315_v39 = vadd.f32 %v314_v36, %v309_v37 }
 0x1c4   : > { %v316_v40 = vsub.f32 %v315_v39, %v288_v38 }
 0x1c6   : > { %619 = vrcp.f32 %v316_v40 }
 0x1d0   : > { %v620_v41 = vpop.eup %619 }
 0x1d1   : > { %v318_v42 = vmul.f32 %v620_v41, %v288_v38 }
 0x1d3   : > { %v320_v43 = vsel %vm319_vm0, %v318_v42, -inf }
 0x1d4   : > { %343 = vmax.xlane.f32.xlu0 %v320_v43  ;;  %v321_v44 = vrot.slane %v320_v43, 4 }
 0x1d6   : > { %v322_v45 = vmax.f32 %v320_v43, %v321_v44 }
 0x1d8   : > { %v323_v46 = vrot.slane %v322_v45, 2 }
 0x1da   : > { %v324_v47 = vmax.f32 %v322_v45, %v323_v46 }
 0x1dc   : > { %v325_v48 = vrot.slane %v324_v47, 1 }
 0x1de   : > { %v326_v49 = vmax.f32 %v324_v47, %v325_v48 }
 0x1e0   : > { %vm329_vm1 = vcmp.eq.f32.partialorder %v318_v42, %v326_v49  ;;  %341 = vst [vmem:[%s228_s25] sm:$0x1] %v326_v49 }
 0x1e1   : > { %v330_v50 = vsel %vm329_vm1, %v253_v11, 4 }
 0x1e2   : > { %v331_v51 = vsel %vm319_vm0, %v330_v50, 2147483647 }
 0x1e3   : > { %v332_v52 = vrot.slane %v331_v51, 4 }
 0x1e5   : > { %vm333_vm2 = vcmp.lt.s32.totalorder %v331_v51, %v332_v52 }
 0x1e6   : > { %v334_v53 = vsel %vm333_vm2, %v331_v51, %v332_v52 }
 0x1e7   : > { %v335_v54 = vrot.slane %v334_v53, 2 }
 0x1e9   : > { %vm336_vm3 = vcmp.lt.s32.totalorder %v334_v53, %v335_v54 }
 0x1ea   : > { %v337_v55 = vsel %vm336_vm3, %v334_v53, %v335_v54 }
 0x1eb   : > { %v338_v56 = vrot.slane %v337_v55, 1 }
 0x1ed   : > { %vm339_vm4 = vcmp.lt.s32.totalorder %v337_v55, %v338_v56 }
 0x1ee   : > { %v340_v57 = vsel %vm339_vm4, %v337_v55, %v338_v56 }
 0x1ef   : > { %342 = vst [vmem:[%s234_s30] sm:$0x1] %v340_v57 }
 0x261   : > { %v344_v59 = vpop.xlane.xlu0 %343 }
 0x262   : > { %vm347_vm5 = vcmp.eq.f32.partialorder %v318_v42, %v344_v59 }
 0x263   : > { %v348_v60 = vsel %vm347_vm5, %v346_v58, 128 }
 0x264   : > { %v349_v61 = vsel %vm319_vm0, %v348_v60, 2147483647 }
 0x265   : > { %v351_v62 = vshra.s32 %v349_v61, 16  ;;  %v350_v0 = vand.u32 65535, %v349_v61 }
 0x267   : > { %v353_v63 = vcvt.s32.f32 %v351_v62  ;;  %v352_v2 = vcvt.s32.f32 %v350_v0 }
 0x269   : > { %354 = vmin.xlane.f32.xlu1 %v353_v63 }
 0x2f6   : > { %v980_v1 = vpop.xlane.xlu1 %354 }
 0x2f7   : > { %vm356_vm6 = vcmp.eq.f32.partialorder %v353_v63, %v980_v1 }
 0x2f8   : > { %v357_v3 = vsel %vm356_vm6, %v352_v2, inf }
 0x2f9   : > { %358 = vmin.xlane.f32.xlu0 %v357_v3 }
 0x2fa   : > { %692 = shalt.err (!%p689_p10)
}
 0x2fb   : > { %s693_s11 = scalar_lea.hbm %s991_s28, 16  ;;  %s697_s21 = scalar_lea.hbm %s1064_s2, 32 }
 0x2fc   : > { %p694_p1 = scmp.ne.s32.totalorder %s991_s28, %s693_s11  ;;  %p698_p3 = scmp.lt.u32.totalorder %s991_s28, %s1064_s2 }
 0x2fd   : > { %p699_p4 = scmp.lt.u32.totalorder %s697_s21, %s693_s11  ;;  %p701_p6 = scmp.lt.u32.totalorder %s693_s11, %s991_s28 }
 0x2fe   : > { %p695_p2 = pnand %p694_p1, %p910_p8 }
 0x2ff   : > { %p700_p11 = por %p699_p4, %p698_p3 }
 0x300   : > { %p696_p7 = pneg %p695_p2 }
 0x301   : > { %p702_p9 = por %p701_p6, %p700_p11 }
 0x303   : > { %p703_p12 = pnand %p702_p9, %p696_p7 }
 0x305   : > { %706 = shalt.err (!%p703_p12)
}
 0x306   : > { %551 = dma.vmem_to_hbm [thread:$0]  (%p910_p8), %s388_s9, 16, %s991_s28, %s367_s27  }
 0x307   : > { %s1016_s6 = scalar_lea.hbm %s1065_s3, %s541_s8  ;;  %s400_s7 = sshll.u32 %s234_s30, 4  ;;  %s401_s7 = int_to_ptr.vmem [resolvable:$true] %s400_s7 }
 0x308   : > { %s371_s10 = scalar_lea.sflag [#allocation9], %s959_s29  ;;  %s707_s11 = scalar_lea.vmem %s401_s7, 16 }
 0x309   : > { %p708_p13 = scmp.ne.s32.totalorder %s401_s7, %s707_s11  ;;  %s792_s12 = smov [#allocation8]  }
 0x30a   : > { %s711_s23 = sshll.u32 %s792_s12, 4  ;;  %s712_s23 = int_to_ptr.vmem [resolvable:$false] %s711_s23 }
 0x30b   : > { %p709_p0 = pnand %p708_p13, %p910_p8  ;;  %s713_s21 = scalar_lea.vmem %s712_s23, 32 }
 0x30c   : > { %p714_p10 = scmp.lt.s32.totalorder %s401_s7, %s712_s23  ;;  %p715_p1 = scmp.lt.s32.totalorder %s713_s21, %s707_s11 }
 0x30d   : > { %p710_p5 = pneg %p709_p0 }
 0x30e   : > { %p716_p2 = por %p715_p1, %p714_p10 }
 0x310   : > { %p717_p7 = pnand %p716_p2, %p710_p5 }
 0x312   : > { %720 = shalt.err (!%p717_p7)
}
 0x313   : > { %s721_s29 = scalar_lea.hbm %s1016_s6, 16  ;;  %s725_s9 = scalar_lea.hbm %s1065_s3, 32 }
 0x314   : > { %p722_p3 = scmp.ne.s32.totalorder %s1016_s6, %s721_s29  ;;  %p726_p6 = scmp.lt.u32.totalorder %s1016_s6, %s1065_s3 }
 0x315   : > { %p727_p9 = scmp.lt.u32.totalorder %s725_s9, %s721_s29  ;;  %p729_p13 = scmp.lt.u32.totalorder %s721_s29, %s1016_s6 }
 0x316   : > { %p723_p4 = pnand %p722_p3, %p910_p8 }
 0x317   : > { %p728_p12 = por %p727_p9, %p726_p6 }
 0x318   : > { %p724_p11 = pneg %p723_p4 }
 0x319   : > { %p730_p0 = por %p729_p13, %p728_p12 }
 0x31b   : > { %p731_p5 = pnand %p730_p0, %p724_p11 }
 0x31d   : > { %734 = shalt.err (!%p731_p5)
}
 0x31e   : > { %552 = dma.vmem_to_hbm [thread:$0]  (%p910_p8), %s401_s7, 16, %s1016_s6, %s371_s10   ;;  %v361_v4 = vcvt.f32.s32 %v980_v1  ;;  %vm364_vm7 = vcmask 3072  }
 0x31f   : > { %p241_p10 = scmp.lt.s32.totalorder %s839_s19, 1 }
 0x320   : > { %v362_v6 = vshll.u32 %v361_v4, 16 }
 0x321   : > { %s1092_s19 = smov (!%p241_p10, %s839_s19), 1 }
 0x322   : > { %s540_s25 = sshll.u32 %s1092_s19, 2 }
 0x323   : > { %s244_s5 = scalar_lea.vmem %s1066_s4, %s540_s25 }
 0x386   : > { %v359_v5 = vpop.xlane.xlu0 %358 }
 0x387   : > { %v360_v7 = vcvt.f32.s32 %v359_v5 }
 0x389   : > { %v363_v8 = vadd.s32 %v362_v6, %v360_v7 }
 0x38b   : > { %365 = vst.msk [vmem:[%s244_s5] sm:$0xf] %vm364_vm7, %v363_v8 }
 0x38c PF: > { %s415_s24 = sand.u32 1, %s769_s15   ;;  %p1085_p8 = scmp.ne.s32.totalorder %s1071_s22, 0 }
 0x38d   : > { %p1086_p1 = scmp.ge.s32.totalorder %s781_s18, 2  ;;  %s416_s6 = scalar_lea.sflag [#allocation4], %s415_s24 }
 0x38f   : > { %p564_p2 = pnand %p1086_p1, %p1085_p8 }
 0x391   : > { %760 = dma.done.wait (!%p564_p2), %s416_s6, 16  }
 0x392   : > { %762 = vsyncadd (!%p564_p2), %s416_s6, 4294967280  ;;  %s424_s19 = scalar_lea.sflag [#allocation9], %s415_s24 }
 0x393   : > { %764 = dma.done.wait (!%p564_p2), %s424_s19, 16  }
 0x394   : > { %766 = vsyncadd (!%p564_p2), %s424_s19, 4294967280  ;;  %p22_p7 = scmp.ge.s32.totalorder %s866_s26, 4   ;;  %s1087_s15 = smov %s773_s16 }
 0x395   : > { %s1088_s16 = smov %s777_s17  ;;  %s1089_s17 = smov %s902_s20 }
 0x396   : > { %s1090_s18 = smov %s866_s26  ;;  %24 = sbr.rel (!%p22_p7) target bundleno = 8 (0x8), region = 106 }
 0x39d   :  { %435 = vsyncpa [#allocation3], 1 }
 0x39e   :  { %437 = vsyncpa [#allocation3 + $0x1], 1 }
 0x39f   :  { %438 = vsyncpa [#allocation6], 1 }
 0x3a0   :  { %439 = vsyncpa [#allocation4], 1 }
 0x3a1   :  { %441 = vsyncpa [#allocation4 + $0x1], 1 }
 0x3a2   :  { %442 = vsyncpa [#allocation9], 1 }
 0x3a3   :  { %444 = vsyncpa [#allocation9 + $0x1], 1 }

</bundles_post_ra>
